<compile_context>
chip_gen: v7x
topology: tpu7x:2x2x1
jax: 0.10.0
libtpu: 0.0.40
codegen_flags: <defaults>
</compile_context>

<pallas_src>
import math

import jax
import jax.numpy as jnp
from jax.experimental import pallas as pl
from jax.experimental.pallas import tpu as pltpu


def _copy_kernel(x_ref, o_ref):
    # Pure streaming copy of an already-squeezed, lane-dense tile.
    o_ref[...] = x_ref[...]


def _sublane_multiple(dtype) -> int:
    # Sublane packing: f32 -> 8, bf16/f16 -> 16, int8/fp8 -> 32.
    itemsize = jnp.dtype(dtype).itemsize
    return {4: 8, 2: 16, 1: 32}.get(itemsize, 8)


def _tile_cap_and_vmem_limit():
    """Per-generation tile-byte cap and explicit scoped-VMEM limit."""
    try:
        kind = jax.devices()[0].device_kind.lower()
    except Exception:  # pragma: no cover - defensive; fall back to safe values
        kind = ""
    if "v7" in kind:
        # v7x: 64 MiB physical VMEM, ~3.2 TB/s HBM -> bigger tiles pay off.
        # 4 double-buffered 8 MiB tiles = 32 MiB, well under the 48 MiB limit.
        return 8 * 1024 * 1024, 48 * 1024 * 1024
    # v5e / v6e: 4 MiB tiles -> 16 MiB of double buffers; explicit 32 MiB
    # limit keeps this safe above v5e's 16 MiB default scoped VMEM.
    return 4 * 1024 * 1024, 32 * 1024 * 1024


def _choose_cols(total: int, max_cols: int = 16384) -> int:
    """Largest multiple of 128 (<= max_cols) that exactly divides total."""
    for k in range(min(max_cols, total) // 128, 0, -1):
        if total % (128 * k) == 0:
            return 128 * k
    return 0


def _choose_row_block(rows: int, sub: int, max_rows: int) -> int:
    """Pick a row block: exact divisor of rows, multiple of the sublane
    packing when possible, <= max_rows, and leaving >=2 grid steps when rows
    allow it (so both v7x TensorCores get work)."""
    upper = min(rows, max_rows)
    if rows >= 2 * sub:
        upper = min(upper, rows // 2)   # guarantee at least 2 grid steps
    upper = max(1, upper)

    # Prefer an exact divisor of rows that is a multiple of `sub`.
    start = (upper // sub) * sub
    for rb in range(start, 0, -sub):
        if rows % rb == 0:
            return rb
    # Fall back: any exact divisor (still no masked edge tile).
    for rb in range(upper, 0, -1):
        if rows % rb == 0:
            return rb
    return min(rows, upper)


def pallas_squeeze_copy(
    x: jax.Array,
    dim: int,
    *,
    small_input_bypass: bool = True,
    min_pallas_bytes: int = 4 * 1024 * 1024,
) -> jax.Array:
    """Materializing squeeze via a Pallas copy kernel (lane-dense 2-D tiling)."""
    nd = x.ndim
    d = dim % nd
    if x.shape[d] != 1:
        out_shape = x.shape              # torch no-op path: same shape copy
    else:
        out_shape = tuple(s for i, s in enumerate(x.shape) if i != d)

    total = math.prod(out_shape) if out_shape else 1
    itemsize = jnp.dtype(x.dtype).itemsize

    # Below a few MiB the ~0.35 us/grid-step + launch overhead dominates;
    # the metadata reshape is strictly faster on every TPU generation.
    if small_input_bypass and total * itemsize < min_pallas_bytes:
        return jnp.reshape(x, out_shape)

    cols = _choose_cols(total)
    if cols == 0:
        # Too small / awkward to tile; squeeze is a free metadata op anyway.
        return jnp.reshape(x, out_shape)

    rows = total // cols
    # Metadata-only reshape to the flat, lane-dense view (no data movement).
    x2 = jnp.reshape(x, (rows, cols))

    tile_bytes_cap, vmem_limit = _tile_cap_and_vmem_limit()
    sub = _sublane_multiple(x.dtype)
    max_rows = max(1, tile_bytes_cap // (cols * itemsize))
    row_block = _choose_row_block(rows, sub, max_rows)
    grid = (rows // row_block,)          # exact divisor -> no masked edge tile

    out2 = pl.pallas_call(
        _copy_kernel,
        out_shape=jax.ShapeDtypeStruct((rows, cols), x.dtype),
        grid=grid,
        in_specs=[pl.BlockSpec((row_block, cols), lambda i: (i, 0))],
        out_specs=pl.BlockSpec((row_block, cols), lambda i: (i, 0)),
        compiler_params=pltpu.CompilerParams(
            dimension_semantics=("parallel",),
            vmem_limit_bytes=vmem_limit,
        ),
        cost_estimate=pl.CostEstimate(
            flops=0,
            transcendentals=0,
            bytes_accessed=2 * rows * cols * itemsize,
        ),
    )(x2)
    return jnp.reshape(out2, out_shape)


def pallas_squeeze(x: jax.Array, dim: int, *, force_pallas_copy: bool = False) -> jax.Array:
    """torch-style squeeze(dim). Default path is the free metadata reshape."""
    nd = x.ndim
    d = dim % nd
    if x.shape[d] != 1:
        return x  # torch semantics: no-op when the dim is not size-1
    if force_pallas_copy:
        return pallas_squeeze_copy(x, dim)
    # Highest-value path: zero HBM traffic, XLA lowers to a bitcast reshape.
    return jnp.squeeze(x, axis=d)


class Squeeze:
    """JAX/Pallas counterpart of the PyTorch `Squeeze` module."""

    def __init__(self, dim: int):
        self.dim = dim

    def __call__(self, tensor: jax.Array) -> jax.Array:
        return pallas_squeeze(tensor, self.dim)


if __name__ == "__main__":
    key = jax.random.PRNGKey(0)
    # Shape consistent with the module's usage: N=2, C=4, singleton axis at
    # position 2, spatial 16x16.  Squeeze(dim=2) -> (2, 4, 16, 16).
    x = jax.random.normal(key, (2, 4, 1, 16, 16), dtype=jnp.float32)
    ref = jnp.squeeze(x, axis=2)

    # 1) Module path (free metadata squeeze).
    out_fast = jax.block_until_ready(Squeeze(dim=2)(x))
    assert out_fast.shape == ref.shape and out_fast.dtype == ref.dtype
    assert bool(jnp.allclose(out_fast, ref))

    # 2) Explicit Pallas copy-kernel path (bypass disabled so the kernel runs
    #    even for this tiny demo tensor).
    out_pallas = jax.block_until_ready(
        pallas_squeeze_copy(x, 2, small_input_bypass=False))
    assert out_pallas.shape == ref.shape and out_pallas.dtype == ref.dtype
    assert bool(jnp.allclose(out_pallas, ref)), "Pallas squeeze copy mismatch"

    # 3) Slightly larger input exercising the >=2-grid-step / divisor-aligned
    #    tiling path (still small: 2*4*1*128*256 f32 = 1 MiB).
    key2 = jax.random.PRNGKey(0)
    xm = jax.random.normal(key2, (2, 4, 1, 128, 256), dtype=jnp.float32)
    out_m = jax.block_until_ready(
        pallas_squeeze_copy(xm, 2, small_input_bypass=False))
    assert out_m.shape == (2, 4, 128, 256)
    assert bool(jnp.allclose(out_m, jnp.squeeze(xm, axis=2)))

    # 4) Negative-dim and bf16 coverage through the kernel path.
    xb = jax.random.normal(key, (2, 4, 1, 16, 16), dtype=jnp.bfloat16)
    out_b = jax.block_until_ready(
        pallas_squeeze_copy(xb, -3, small_input_bypass=False))
    assert out_b.shape == (2, 4, 16, 16)
    assert bool(jnp.all(out_b == jnp.squeeze(xb, axis=2)))

    # 5) Small-input bypass (default): returns the free metadata reshape.
    out_bypass = jax.block_until_ready(pallas_squeeze_copy(x, 2))
    assert bool(jnp.allclose(out_bypass, ref))

    # 6) PyTorch no-op path (dim with size != 1 returns input unchanged).
    y = jax.random.normal(key, (2, 4, 16, 16), dtype=jnp.float32)
    out_noop = Squeeze(dim=1)(y)
    assert out_noop.shape == y.shape

    print("KERNEL_OK")
</pallas_src>

<mosaic_0001>
module attributes {stable_mosaic.version = 11 : i64} {
  func.func @_copy_kernel(%arg0: i32, %arg1: memref<1x2048xf32, #tpu.memory_space<vmem>>, %arg2: memref<1x2048xf32, #tpu.memory_space<vmem>>) attributes {dimension_semantics = [#tpu.dimension_semantics<parallel>], iteration_bounds = array<i64: 1>, scalar_prefetch = 0 : i64, scratch_operands = 0 : i64, tpu.core_type = #tpu.core_type<tc>, window_params = [{transform_indices = @transform_0, window_bounds = array<i64: 1, 2048>}, {transform_indices = @transform_1, window_bounds = array<i64: 1, 2048>}]} {
    %c0 = arith.constant 0 : index
    %c0_0 = arith.constant 0 : index
    %0 = vector.load %arg1[%c0, %c0_0] : memref<1x2048xf32, #tpu.memory_space<vmem>>, vector<1x2048xf32>
    %c0_1 = arith.constant 0 : index
    %c0_2 = arith.constant 0 : index
    %1 = vector.load %arg2[%c0_1, %c0_2] : memref<1x2048xf32, #tpu.memory_space<vmem>>, vector<1x2048xf32>
    tpu.vector_store %arg2[%c0_1, %c0_2], %0 {strides = array<i32>} : memref<1x2048xf32, #tpu.memory_space<vmem>>, vector<1x2048xf32>,
    return
  }
  func.func @transform_0(%arg0: i32) -> (i32, i32) {
    %c0_i32 = arith.constant 0 : i32
    %c0_i32_0 = arith.constant 0 : i32
    return %arg0, %c0_i32 : i32, i32
  }
  func.func @transform_1(%arg0: i32) -> (i32, i32) {
    %c0_i32 = arith.constant 0 : i32
    %c0_i32_0 = arith.constant 0 : i32
    return %arg0, %c0_i32 : i32, i32
  }
}

</mosaic_0001>

<bundles_post_ra>
// kernel: tpu_custom_call.1
= control target key start
LH: loop header
LB: loop body
LE: loop exit
PB: predicated region body
PF: predicated region fallthrough
CT: control target
= control target key end

     0   :  { %6 = vsyncpa [#allocation3], 0  ;;  %s126_s0 = inlined_call_operand.hbm [shape: f32[1,2048], index: 0, kind: input, shape index: {}]   ;;  %s127_s1 = inlined_call_operand.hbm [shape: f32[1,2048], index: 1, kind: output, shape index: {}]  }
   0x1   :  { %7 = vsyncpa [#allocation4], 0  ;;  %s90_s6 = smov [#allocation2]   ;;  %s42_s10 = scalar_lea.hbm %s126_s0, 256 }
   0x2   :  { %s14_s7 = sshll.u32 %s90_s6, 4  ;;  %p43_p0 = scmp.ne.s32.totalorder %s126_s0, %s42_s10  ;;  %s15_s7 = int_to_ptr.vmem [resolvable:$true] %s14_s7 }
   0x3   :  { %p46_p1 = scmp.lt.u32.totalorder %s42_s10, %s126_s0 }
   0x5   :  { %p48_p2 = pnand %p46_p1, %p43_p0 }
   0x7   :  { %51 = shalt.err (!%p48_p2)
}
   0x8   :  { %s52_s15 = scalar_lea.vmem %s15_s7, 256  ;;  %p57_p4 = scmp.lt.s32.totalorder %s15_s7, %s15_s7 }
   0x9   :  { %p53_p3 = scmp.ne.s32.totalorder %s15_s7, %s52_s15  ;;  %p58_p5 = scmp.lt.s32.totalorder %s52_s15, %s52_s15 }
   0xb   :  { %p59_p6 = por %p58_p5, %p57_p4 }
   0xd   :  { %p60_p7 = pnand %p59_p6, %p53_p3 }
   0xf   :  { %63 = shalt.err (!%p60_p7)
}
  0x10   :  { %17 = dma.hbm_to_vmem [thread:$0]  %s126_s0, 256, %s15_s7, [#allocation3]  }
  0x11   :  { %86 = dma.done.wait [#allocation3], 256  }
  0x12   :  { %87 = vsyncadd [#allocation3], 4294967040  ;;  %s91_s18 = smov [#allocation5]   ;;  %v21_v0 = vld [vmem:[#allocation2] sm:$0xff]  ;;  %v22_v1 = vld [vmem:[#allocation2 + $0x8] sm:$0xff] }
  0x13   :  { %s31_s19 = sshll.u32 %s91_s18, 4  ;;  %23 = vst [vmem:[#allocation5] sm:$0xff] %v21_v0  ;;  %24 = vst [vmem:[#allocation5 + $0x8] sm:$0xff] %v22_v1  ;;  %s32_s19 = int_to_ptr.vmem [resolvable:$true] %s31_s19 }
  0x14   :  { %s64_s20 = scalar_lea.vmem %s32_s19, 256  ;;  %p69_p9 = scmp.lt.s32.totalorder %s32_s19, %s32_s19 }
  0x15   :  { %p65_p8 = scmp.ne.s32.totalorder %s32_s19, %s64_s20  ;;  %p70_p10 = scmp.lt.s32.totalorder %s64_s20, %s64_s20 }
  0x17   :  { %p71_p11 = por %p70_p10, %p69_p9 }
  0x19   :  { %p72_p12 = pnand %p71_p11, %p65_p8 }
  0x1b   :  { %75 = shalt.err (!%p72_p12)
}
  0x1c   :  { %s76_s0 = scalar_lea.hbm %s127_s1, 256 }
  0x1d   :  { %p77_p13 = scmp.ne.s32.totalorder %s127_s1, %s76_s0  ;;  %p80_p0 = scmp.lt.u32.totalorder %s76_s0, %s127_s1 }
  0x1f   :  { %p82_p1 = pnand %p80_p0, %p77_p13 }
  0x21   :  { %85 = shalt.err (!%p82_p1)
}
  0x22   :  { %34 = dma.vmem_to_hbm [thread:$0]  %s32_s19, 256, %s127_s1, [#allocation4]  }
  0x23   :  { %88 = dma.done.wait [#allocation4], 256  }
  0x24   :  { %89 = vsyncadd [#allocation4], 4294967040 }
  0x25   :  { %38 = vsyncpa [#allocation3], 1 }
  0x26   :  { %39 = vsyncpa [#allocation4], 1 }

</bundles_post_ra>
